<compile_context>
chip_gen: v7x
topology: tpu7x:2x2x1
jax: 0.10.0
libtpu: 0.0.40
codegen_flags: <defaults>
</compile_context>

<pallas_src>
import functools
import math

import jax
import jax.numpy as jnp
import numpy as np
from jax import lax
from jax.experimental import pallas as pl
from jax.experimental.pallas import tpu as pltpu

TWO_PI = 2.0 * math.pi
INV_TWO_PI = 1.0 / TWO_PI


def _cqt_frequencies(fmin, n_bins, bins_per_octave):
    # librosa.time_frequency.cqt_frequencies: fmin * 2**(k / bins_per_octave)
    k = np.arange(n_bins, dtype=np.float64)
    return fmin * (2.0 ** (k / bins_per_octave))


def make_params(sr=16000, fmin=30, n_bins=256, bins_per_octave=32, hop_length=128):
    freqs = _cqt_frequencies(fmin, n_bins, bins_per_octave)
    fixed_phase_diff = ((1.0 * freqs * hop_length / sr + 0.5) % 1 - 0.5) * 2 * np.pi
    scaling = 1.0 / np.log(freqs)
    return (jnp.asarray(scaling, dtype=jnp.float32),
            jnp.asarray(fixed_phase_diff, dtype=jnp.float32))


def _wrap(phase):
    # x % (2*pi) via explicit floor (cheap VALU ops; no divide / sign-fix selects).
    return phase - TWO_PI * jnp.floor(phase * INV_TWO_PI)


def _phase_accum_kernel(x_ref, u_ref, inv_scale_ref, pd_ref, o_ref, carry_ref,
                        *, total_t, n_sub, sub_w_in, sub_w_out):
    # x_ref:         (1, bin_blk, n_sub*sub_w_in)   input time tile (lanes = time)
    # u_ref:         (sub_w_in, sub_w_out) bf16     strictly-upper ones (exclusive scan)
    # inv_scale_ref: (bin_blk, 1)                    1 / scaling
    # pd_ref:        (bin_blk, 1)                    fixed phase diff
    # o_ref:         (1, bin_blk, n_sub*sub_w_out)   output time tile
    # carry_ref:     (bin_blk, 1)                    running phase across time tiles
    t = pl.program_id(2)

    @pl.when(t == 0)
    def _init():
        carry_ref[...] = jnp.zeros_like(carry_ref)

    inv_s = inv_scale_ref[...]
    pd = pd_ref[...]
    u = u_ref[...]                                   # bf16, exact 0/1 entries

    tile_start = t * (n_sub * sub_w_in)
    offset = carry_ref[...]                          # (bin_blk, 1) running phase

    # Two-level scan: per 256-wide sub-block an MXU exclusive prefix, plus a running
    # in-tile offset carried across sub-blocks (and across tiles via carry_ref).
    for s in range(n_sub):
        xs = x_ref[0, :, s * sub_w_in:(s + 1) * sub_w_in]   # (bin_blk, sub_w_in)
        adj = xs * inv_s - pd

        # Mask columns beyond the true time extent (partial tail tile / clamped
        # extra output tile).  Also kills any garbage in padded partial blocks.
        col = lax.broadcasted_iota(jnp.int32, adj.shape, 1)
        adj = jnp.where(col < (total_t - (tile_start + s * sub_w_in)), adj, 0.0)

        # Split-operand bf16 matmul: two MXU passes, f32 accumulation.  U is exact in
        # bf16, so only the LHS needs the hi/lo split (~16-bit effective mantissa).
        adj_hi = adj.astype(jnp.bfloat16)
        adj_lo = (adj - adj_hi.astype(jnp.float32)).astype(jnp.bfloat16)
        prefix = jnp.dot(adj_hi, u, preferred_element_type=jnp.float32)
        prefix = prefix + jnp.dot(adj_lo, u, preferred_element_type=jnp.float32)

        phase = offset + prefix                               # (bin_blk, sub_w_out)
        o_ref[0, :, s * sub_w_out:(s + 1) * sub_w_out] = _wrap(phase) - math.pi

        # Inclusive sub-block sum from the exclusive prefix (no XLU lane reduction
        # on the serial carry path): sum = prefix[:, last] + adj[:, last].
        offset = (offset
                  + prefix[:, sub_w_in - 1:sub_w_in]
                  + adj[:, sub_w_in - 1:sub_w_in])

    # Carry the running phase (re-wrapped mod 2*pi for f32 accuracy) into the next tile.
    carry_ref[...] = _wrap(offset)


def phase_accumulation(x, scaling, fixed_phase_diff, *, sub_w=256, max_sub=4):
    """x: (B, n_bins, T) float32 -> (B, n_bins, T+1) float32 (native layout)."""
    B, n_bins, T = x.shape
    x = x.astype(jnp.float32)

    # Bin-chunk axis: gives the v7x second TensorCore work even for tiny B.
    bin_blk = 128 if (n_bins % 128 == 0) else n_bins
    n_chunks = n_bins // bin_blk

    if T + 1 <= sub_w:
        # Single small tile: block widths equal full dims (no 128-alignment needed).
        n_sub, sub_w_in, sub_w_out = 1, T, T + 1
    else:
        # Two-level scan; keep the tile width <= T so blocks never exceed array dims.
        n_sub = max(1, min(max_sub, T // sub_w))
        sub_w_in = sub_w_out = sub_w
    w_in = n_sub * sub_w_in
    w_out = n_sub * sub_w_out
    num_out_tiles = pl.cdiv(T + 1, w_out)
    num_in_tiles = pl.cdiv(T, w_in)
    last_in_tile = num_in_tiles - 1

    inv_scale = (1.0 / scaling.astype(jnp.float32)).reshape(n_bins, 1)
    pd = fixed_phase_diff.astype(jnp.float32).reshape(n_bins, 1)

    # Strictly upper-triangular ones: U[i, k] = 1 iff i < k (exclusive prefix).
    # Exactly representable in bf16 -> ship it as bf16 for the split-operand matmul.
    u = (jnp.arange(sub_w_in, dtype=jnp.int32)[:, None]
         < jnp.arange(sub_w_out, dtype=jnp.int32)[None, :]).astype(jnp.bfloat16)

    kernel = functools.partial(_phase_accum_kernel, total_t=T, n_sub=n_sub,
                               sub_w_in=sub_w_in, sub_w_out=sub_w_out)

    return pl.pallas_call(
        kernel,
        out_shape=jax.ShapeDtypeStruct((B, n_bins, T + 1), jnp.float32),
        grid_spec=pltpu.PrefetchScalarGridSpec(
            num_scalar_prefetch=0,
            grid=(B, n_chunks, num_out_tiles),
            in_specs=[
                # Input tile shares the output tile's aligned offset; clamp so the DMA
                # never starts past the end of x (a clamped tile is fully masked).
                pl.BlockSpec((1, bin_blk, w_in),
                             lambda b, c, t: (b, c, jnp.minimum(t, last_in_tile))),
                pl.BlockSpec((sub_w_in, sub_w_out), lambda b, c, t: (0, 0)),  # once
                pl.BlockSpec((bin_blk, 1), lambda b, c, t: (c, 0)),
                pl.BlockSpec((bin_blk, 1), lambda b, c, t: (c, 0)),
            ],
            out_specs=pl.BlockSpec((1, bin_blk, w_out), lambda b, c, t: (b, c, t)),
            scratch_shapes=[pltpu.VMEM((bin_blk, 1), jnp.float32)],
        ),
        compiler_params=pltpu.CompilerParams(
            dimension_semantics=("parallel", "parallel", "arbitrary")),
    )(x, u, inv_scale, pd)


def _reference_f64(x, scaling, fixed_phase_diff):
    # Ground truth in float64 numpy, mirroring the PyTorch forward exactly.
    x = np.asarray(x, dtype=np.float64)
    s = np.asarray(scaling, dtype=np.float64).reshape(1, -1, 1)
    pd = np.asarray(fixed_phase_diff, dtype=np.float64).reshape(1, -1, 1)
    y = x / s - pd
    start = np.zeros((x.shape[0], x.shape[1], 1), dtype=np.float64)
    y = np.concatenate([start, y], axis=2)
    y = np.cumsum(y, axis=2)
    return np.mod(y, TWO_PI) - np.pi


def _max_circular_err(a, b):
    # Phase-aware error: |a - b| modulo 2*pi (ignores exact-wrap-boundary jumps).
    d = np.asarray(a, dtype=np.float64) - np.asarray(b, dtype=np.float64)
    d = np.mod(d + np.pi, TWO_PI) - np.pi
    return float(np.max(np.abs(d)))


if __name__ == "__main__":
    n_bins = 256
    scaling, fixed_phase_diff = make_params(n_bins=n_bins)
    key = jax.random.PRNGKey(0)

    # (B, T, tolerance):
    #   T=8    small single-tile path (full-dim blocks)
    #   T=300  single generic tile with partial-tail masking
    #   T=512  exact multiple of the tile -> clamped, fully masked extra output tile
    #   T=1300 two-level scan (n_sub=4) with cross-tile carry and a partial tail
    # Tolerances account for the split-bf16 MXU path (~16-bit mantissa) and f32
    # accumulation of an unbounded running phase (reference is f64; both wrap).
    checks = [
        (2, 8, 2e-3),
        (2, 300, 2e-2),
        (2, 512, 2e-2),
        (2, 1300, 3e-2),
    ]

    for i, (B, T, tol) in enumerate(checks):
        k = jax.random.fold_in(key, i)
        x = jax.random.normal(k, (B, n_bins, T), dtype=jnp.float32)

        out = jax.block_until_ready(phase_accumulation(x, scaling, fixed_phase_diff))
        assert out.shape == (B, n_bins, T + 1), (out.shape, (B, n_bins, T + 1))

        ref = _reference_f64(x, scaling, fixed_phase_diff)
        err = _max_circular_err(out, ref)
        assert err < tol, f"T={T}: max circular error {err} >= {tol}"

    print("KERNEL_OK")
</pallas_src>

<mosaic_0001>
module attributes {stable_mosaic.version = 11 : i64} {
  func.func @_phase_accum_kernel(%arg0: i32, %arg1: i32, %arg2: i32, %arg3: memref<1x128x8xf32, #tpu.memory_space<vmem>>, %arg4: memref<8x9xbf16, #tpu.memory_space<vmem>>, %arg5: memref<128x1xf32, #tpu.memory_space<vmem>>, %arg6: memref<128x1xf32, #tpu.memory_space<vmem>>, %arg7: memref<1x128x9xf32, #tpu.memory_space<vmem>>, %arg8: memref<128x1xf32, #tpu.memory_space<vmem>>) attributes {dimension_semantics = [#tpu.dimension_semantics<parallel>, #tpu.dimension_semantics<parallel>, #tpu.dimension_semantics<arbitrary>], iteration_bounds = array<i64: 2, 2, 1>, scalar_prefetch = 0 : i64, scratch_operands = 1 : i64, tpu.core_type = #tpu.core_type<tc>, window_params = [{transform_indices = @transform_0, window_bounds = array<i64: 1, 128, 8>}, {pipeline_mode = #tpu.pipeline_mode<synchronous>, transform_indices = @transform_1, window_bounds = array<i64: 8, 9>}, {transform_indices = @transform_2, window_bounds = array<i64: 128, 1>}, {transform_indices = @transform_3, window_bounds = array<i64: 128, 1>}, {transform_indices = @transform_4, window_bounds = array<i64: 1, 128, 9>}]} {
    %c0_i32 = arith.constant 0 : i32
    %0 = arith.cmpi eq, %arg2, %c0_i32 : i32
    %1 = arith.extui %0 : i1 to i32
    %c0_i32_0 = arith.constant 0 : i32
    %2 = arith.cmpi ne, %1, %c0_i32_0 : i32
    scf.if %2 {
      %cst_25 = arith.constant 0.000000e+00 : f32
      %52 = vector.broadcast %cst_25 : f32 to vector<128x1xf32>
      %c0_26 = arith.constant 0 : index
      %c0_27 = arith.constant 0 : index
      %53 = vector.load %arg8[%c0_26, %c0_27] : memref<128x1xf32, #tpu.memory_space<vmem>>, vector<128x1xf32>
      tpu.vector_store %arg8[%c0_26, %c0_27], %52 {strides = array<i32>} : memref<128x1xf32, #tpu.memory_space<vmem>>, vector<128x1xf32>,
    } else {
    }
    %c0 = arith.constant 0 : index
    %c0_1 = arith.constant 0 : index
    %3 = vector.load %arg5[%c0, %c0_1] : memref<128x1xf32, #tpu.memory_space<vmem>>, vector<128x1xf32>
    %c0_2 = arith.constant 0 : index
    %c0_3 = arith.constant 0 : index
    %4 = vector.load %arg6[%c0_2, %c0_3] : memref<128x1xf32, #tpu.memory_space<vmem>>, vector<128x1xf32>
    %c0_4 = arith.constant 0 : index
    %c0_5 = arith.constant 0 : index
    %5 = vector.load %arg4[%c0_4, %c0_5] : memref<8x9xbf16, #tpu.memory_space<vmem>>, vector<8x9xbf16>
    %c8_i32 = arith.constant 8 : i32
    %6 = arith.muli %arg2, %c8_i32 : i32
    %c0_6 = arith.constant 0 : index
    %c0_7 = arith.constant 0 : index
    %7 = vector.load %arg8[%c0_6, %c0_7] : memref<128x1xf32, #tpu.memory_space<vmem>>, vector<128x1xf32>
    %c0_8 = arith.constant 0 : index
    %c0_9 = arith.constant 0 : index
    %c0_10 = arith.constant 0 : index
    %8 = vector.load %arg3[%c0_8, %c0_9, %c0_10] : memref<1x128x8xf32, #tpu.memory_space<vmem>>, vector<1x128x8xf32>
    %9 = vector.shape_cast %8 : vector<1x128x8xf32> to vector<128x8xf32>
    %10 = vector.broadcast %3 : vector<128x1xf32> to vector<128x8xf32>
    %11 = arith.mulf %9, %10 : vector<128x8xf32>
    %12 = vector.broadcast %4 : vector<128x1xf32> to vector<128x8xf32>
    %13 = arith.subf %11, %12 : vector<128x8xf32>
    %14 = tpu.iota {dimensions = array<i32: 1>} : vector<128x8xi32>
    %c0_i32_11 = arith.constant 0 : i32
    %15 = arith.addi %6, %c0_i32_11 : i32
    %c8_i32_12 = arith.constant 8 : i32
    %16 = arith.subi %c8_i32_12, %15 : i32
    %17 = vector.broadcast %16 : i32 to vector<128x8xi32>
    %18 = arith.cmpi slt, %14, %17 : vector<128x8xi32>
    %cst = arith.constant 0.000000e+00 : f32
    %19 = vector.broadcast %cst : f32 to vector<128x8xf32>
    %20 = arith.select %18, %13, %19 : vector<128x8xi1>, vector<128x8xf32>
    %21 = arith.truncf %20 : vector<128x8xf32> to vector<128x8xbf16>
    %22 = arith.extf %21 : vector<128x8xbf16> to vector<128x8xf32>
    %23 = arith.subf %20, %22 : vector<128x8xf32>
    %24 = arith.truncf %23 : vector<128x8xf32> to vector<128x8xbf16>
    %cst_13 = arith.constant dense<0.000000e+00> : vector<128x9xf32>
    %25 = tpu.matmul %21, %5, %cst_13 {dimension_numbers = #tpu.dot_dimension_numbers<[1], [0], [0], [1], [0, 0, 1, 1], [], []>} : vector<128x8xbf16>, vector<8x9xbf16>, vector<128x9xf32> -> vector<128x9xf32>
    %cst_14 = arith.constant dense<0.000000e+00> : vector<128x9xf32>
    %26 = tpu.matmul %24, %5, %cst_14 {dimension_numbers = #tpu.dot_dimension_numbers<[1], [0], [0], [1], [0, 0, 1, 1], [], []>} : vector<128x8xbf16>, vector<8x9xbf16>, vector<128x9xf32> -> vector<128x9xf32>
    %27 = arith.addf %25, %26 : vector<128x9xf32>
    %28 = vector.broadcast %7 : vector<128x1xf32> to vector<128x9xf32>
    %29 = arith.addf %28, %27 : vector<128x9xf32>
    %cst_15 = arith.constant 0.159154937 : f32
    %30 = vector.broadcast %cst_15 : f32 to vector<128x9xf32>
    %31 = arith.mulf %29, %30 : vector<128x9xf32>
    %32 = math.floor %31 : vector<128x9xf32>
    %cst_16 = arith.constant 6.28318548 : f32
    %33 = vector.broadcast %cst_16 : f32 to vector<128x9xf32>
    %34 = arith.mulf %33, %32 : vector<128x9xf32>
    %35 = arith.subf %29, %34 : vector<128x9xf32>
    %cst_17 = arith.constant 3.14159274 : f32
    %36 = vector.broadcast %cst_17 : f32 to vector<128x9xf32>
    %37 = arith.subf %35, %36 : vector<128x9xf32>
    %c0_18 = arith.constant 0 : index
    %c0_19 = arith.constant 0 : index
    %c0_20 = arith.constant 0 : index
    %38 = vector.load %arg7[%c0_18, %c0_19, %c0_20] : memref<1x128x9xf32, #tpu.memory_space<vmem>>, vector<1x128x9xf32>
    %39 = vector.shape_cast %38 : vector<1x128x9xf32> to vector<128x9xf32>
    %40 = vector.shape_cast %37 : vector<128x9xf32> to vector<1x128x9xf32>
    tpu.vector_store %arg7[%c0_18, %c0_19, %c0_20], %40 {strides = array<i32>} : memref<1x128x9xf32, #tpu.memory_space<vmem>>, vector<1x128x9xf32>,
    %41 = vector.extract_strided_slice %27 {offsets = [0, 7], sizes = [128, 1], strides = [1, 1]} : vector<128x9xf32> to vector<128x1xf32>
    %42 = arith.addf %7, %41 : vector<128x1xf32>
    %43 = vector.extract_strided_slice %20 {offsets = [0, 7], sizes = [128, 1], strides = [1, 1]} : vector<128x8xf32> to vector<128x1xf32>
    %44 = arith.addf %42, %43 : vector<128x1xf32>
    %cst_21 = arith.constant 0.159154937 : f32
    %45 = vector.broadcast %cst_21 : f32 to vector<128x1xf32>
    %46 = arith.mulf %44, %45 : vector<128x1xf32>
    %47 = math.floor %46 : vector<128x1xf32>
    %cst_22 = arith.constant 6.28318548 : f32
    %48 = vector.broadcast %cst_22 : f32 to vector<128x1xf32>
    %49 = arith.mulf %48, %47 : vector<128x1xf32>
    %50 = arith.subf %44, %49 : vector<128x1xf32>
    %c0_23 = arith.constant 0 : index
    %c0_24 = arith.constant 0 : index
    %51 = vector.load %arg8[%c0_23, %c0_24] : memref<128x1xf32, #tpu.memory_space<vmem>>, vector<128x1xf32>
    tpu.vector_store %arg8[%c0_23, %c0_24], %50 {strides = array<i32>} : memref<128x1xf32, #tpu.memory_space<vmem>>, vector<128x1xf32>,
    return
  }
  func.func @transform_0(%arg0: i32, %arg1: i32, %arg2: i32) -> (i32, i32, i32) {
    %c0_i32 = arith.constant 0 : i32
    %0 = arith.minsi %arg2, %c0_i32 : i32
    %c0_i32_0 = arith.constant 0 : i32
    return %arg0, %arg1, %0 : i32, i32, i32
  }
  func.func @transform_1(%arg0: i32, %arg1: i32, %arg2: i32) -> (i32, i32) {
    %c0_i32 = arith.constant 0 : i32
    %c0_i32_0 = arith.constant 0 : i32
    %c0_i32_1 = arith.constant 0 : i32
    return %c0_i32, %c0_i32_0 : i32, i32
  }
  func.func @transform_2(%arg0: i32, %arg1: i32, %arg2: i32) -> (i32, i32) {
    %c0_i32 = arith.constant 0 : i32
    %c0_i32_0 = arith.constant 0 : i32
    return %arg1, %c0_i32 : i32, i32
  }
  func.func @transform_3(%arg0: i32, %arg1: i32, %arg2: i32) -> (i32, i32) {
    %c0_i32 = arith.constant 0 : i32
    %c0_i32_0 = arith.constant 0 : i32
    return %arg1, %c0_i32 : i32, i32
  }
  func.func @transform_4(%arg0: i32, %arg1: i32, %arg2: i32) -> (i32, i32, i32) {
    %c0_i32 = arith.constant 0 : i32
    return %arg0, %arg1, %arg2 : i32, i32, i32
  }
}

</mosaic_0001>

<bundles_post_ra>
// kernel: tpu_custom_call.1
= control target key start
LH: loop header
LB: loop body
LE: loop exit
PB: predicated region body
PF: predicated region fallthrough
CT: control target
= control target key end

     0   :  { %s1715_s15 = smov 0   ;;  %s1717_s16 = smov 0   ;;  %s2094_s0 = inlined_call_operand.vmem [shape: f32[2,256,8], index: 0, kind: input, shape index: {}]   ;;  %s2095_s1 = inlined_call_operand.vmem [shape: bf16[8,9], index: 1, kind: input, shape index: {}]   ;;  %s2096_s2 = inlined_call_operand.vmem [shape: f32[256,1], index: 2, kind: input, shape index: {}]   ;;  %s2097_s3 = inlined_call_operand.vmem [shape: f32[256,1], index: 3, kind: input, shape index: {}]   ;;  %s2098_s4 = inlined_call_operand.vmem [shape: f32[2,256,9], index: 4, kind: output, shape index: {}]  }
   0x1   :  { %s1719_s17 = smov 0   ;;  %s1721_s18 = smov 0  }
   0x2   :  { %s1723_s19 = smov 0  }
   0x3 LB: > { %s29_s20 = sadd.s32 1, %s1677_s17  ;;  %s33_s21 = sadd.s32 1, %s1681_s18  ;;  %s1685_s19 = sphi %s1723_s19, %s14_s19   ;;  %s1681_s18 = sphi %s1721_s18, %s2103_s18   ;;  %s1677_s17 = sphi %s1719_s17, %s2102_s17   ;;  %s1673_s16 = sphi %s1717_s16, %s2101_s16   ;;  %s1669_s15 = sphi %s1715_s15, %s2100_s15  }
   0x4   : > { %p31_p0 = scmp.ge.s32.totalorder %s29_s20, 2  ;;  %p1485_p1 = scmp.ge.s32.totalorder %s1685_s19, 1 }
   0x5   : > { %p227_p2 = scmp.lt.s32.totalorder %s1685_s19, 5 }
   0x6   : > { %s2105_s20 = smov (%p31_p0, %s29_s20), 0  ;;  %s2107_s21 = smov (!%p31_p0, %s33_s21), %s1681_s18 }
   0x7   : > { %p228_p3 = pnand %p1485_p1, %p227_p2  ;;  %p35_p4 = scmp.ge.s32.totalorder %s2107_s21, 2 }
   0x8   : > { %s1486_s22 = sshll.u32 (!%p228_p3), %s1669_s15, 4  ;;  %vm326_vm0 = vcmask (!%p228_p3), 7168   ;;  %v1687_v0 = vmov (!%p228_p3), 0   ;;  %v1688_v1 = vmov (!%p228_p3), 0.0   ;;  %vm695_vm1 = vcmask (!%p228_p3), 1043456   ;;  %p282_p6 = scmp.lt.s32.totalorder (!%p228_p3), %s1673_s16, 1 }
   0x9   : > { %s2109_s21 = smov (%p35_p4, %s2107_s21), 0  ;;  %231 = sbr.rel (%p228_p3) target bundleno = 569 (0x239), region = 36 }
   0xa   : > { %1646 = vset.pattern.permute.xlu1 (!%p228_p3), %v1687_v0  ;;  %1645 = vset.pattern.permute.xlu0 (!%p228_p3), %v1687_v0  ;;  %p1750_p5 = scmp.lt.s32.totalorder (!%p228_p3), %s1486_s22, 31  ;;  %328 = vst.msk [vmem:[#allocation2 + $0x8] sm:$0xff] (!%p228_p3), %vm326_vm0, %v1688_v1  ;;  %327 = vst.msk [vmem:[#allocation2] sm:$0xff] (!%p228_p3), %vm326_vm0, %v1688_v1  ;;  %v375_v12 = vld [vmem:[%s2095_s1] sm:$0xf] (!%p228_p3)  ;;  %v601_v54 = vlaneseq (!%p228_p3)  ;;  %vm670_vm3 = vcmask (!%p228_p3), 64512  }
   0xb   : > { %329 = vst.msk [vmem:[#allocation2 + $0x10] sm:$0xff] (!%p228_p3), %vm326_vm0, %v1688_v1  ;;  %330 = vst.msk [vmem:[#allocation2 + $0x18] sm:$0xff] (!%p228_p3), %vm326_vm0, %v1688_v1  ;;  %1601 = vmatprep.subr.msk.bf16.mxu0 (!%p228_p3), %vm695_vm1, %v375_v12  ;;  %v697_v15 = vsel (!%p228_p3), %vm695_vm1, %v375_v12, 0  ;;  %1600 = vmatprep.subr.msk.bf16.mxu1 (!%p228_p3), %vm695_vm1, %v375_v12  ;;  %s1689_s13 = smov (!%p228_p3), 121   ;;  %vm1093_vm4 = vcmask (!%p228_p3), 72704  }
   0xc   : > { %331 = vst.msk [vmem:[#allocation2 + $0x20] sm:$0xff] (!%p228_p3), %vm326_vm0, %v1688_v1  ;;  %332 = vst.msk [vmem:[#allocation2 + $0x28] sm:$0xff] (!%p228_p3), %vm326_vm0, %v1688_v1  ;;  %1567 = vmatpush3.bf16.msra.mxu0 (!%p228_p3), %v697_v15  ;;  %1549 = vmatpush3.bf16.msra.mxu1 (!%p228_p3), %v697_v15  ;;  %v1883_v59 = vand.u32 (!%p228_p3), 127, %v601_v54 }
   0xd   : > { %333 = vst.msk [vmem:[#allocation2 + $0x30] sm:$0xff] (!%p228_p3), %vm326_vm0, %v1688_v1  ;;  %334 = vst.msk [vmem:[#allocation2 + $0x38] sm:$0xff] (!%p228_p3), %vm326_vm0, %v1688_v1 }
   0xe   : > { %335 = vst.msk [vmem:[#allocation2 + $0x40] sm:$0xff] (!%p228_p3), %vm326_vm0, %v1688_v1  ;;  %336 = vst.msk [vmem:[#allocation2 + $0x48] sm:$0xff] (!%p228_p3), %vm326_vm0, %v1688_v1  ;;  %vm605_vm2 = vcmp.lt.s32.totalorder (!%p228_p3), %v1883_v59, 8 }
   0xf   : > { %337 = vst.msk [vmem:[#allocation2 + $0x50] sm:$0xff] (!%p228_p3), %vm326_vm0, %v1688_v1  ;;  %338 = vst.msk [vmem:[#allocation2 + $0x58] sm:$0xff] (!%p228_p3), %vm326_vm0, %v1688_v1 }
  0x10   : > { %339 = vst.msk [vmem:[#allocation2 + $0x60] sm:$0xff] %vm326_vm0, %v1688_v1  ;;  %340 = vst.msk [vmem:[#allocation2 + $0x68] sm:$0xff] %vm326_vm0, %v1688_v1  ;;  %s2111_s22 = smov (!%p1750_p5, %s1486_s22), 31  ;;  %s2113_s16 = smov (!%p282_p6, %s1673_s16), 1 }
  0x11   : > { %341 = vst.msk [vmem:[#allocation2 + $0x70] sm:$0xff] %vm326_vm0, %v1688_v1  ;;  %342 = vst.msk [vmem:[#allocation2 + $0x78] sm:$0xff] %vm326_vm0, %v1688_v1  ;;  %s1490_s24 = sshll.u32 %s2111_s22, 3  ;;  %v1820_v36 = vld [vmem:[#allocation2 + $0x8] sm:$0xff]  ;;  %v1822_v37 = vld [vmem:[#allocation2] sm:$0xff]  ;;  %s1487_s7 = sshll.u32 %s2113_s16, 5 }
  0x12   : > { %s1778_s27 = scalar_lea.vmem %s2096_s2, %s1490_s24  ;;  %s1787_s30 = scalar_lea.vmem %s2097_s3, %s1490_s24  ;;  %v1826_v38 = vld [vmem:[#allocation2 + $0x18] sm:$0xff]  ;;  %v1828_v39 = vld [vmem:[#allocation2 + $0x10] sm:$0xff] }
  0x13   : > { %v345_v2 = vld [vmem:[%s1778_s27 + $0x10] sm:$0xff]  ;;  %v343_v3 = vld [vmem:[%s1778_s27] sm:$0xff]  ;;  %v346_v4 = vld [vmem:[%s1778_s27 + $0x18] sm:$0xff]  ;;  %s1871_s8 = sadd.s32 %s1487_s7, %s2111_s22 }
  0x14   : > { %421 = vperm.xlu1 %1646, %v345_v2   ;;  %411 = vperm.xlu0 %1645, %v343_v3   ;;  %v344_v5 = vld [vmem:[%s1778_s27 + $0x8] sm:$0xff]  ;;  %v359_v7 = vld [vmem:[%s1787_s30] sm:$0xff]  ;;  %v362_v8 = vld [vmem:[%s1787_s30 + $0x18] sm:$0xff]  ;;  %s1488_s9 = sshll.u32 %s1871_s8, 3 }
  0x15   : > { %v360_v6 = vld [vmem:[%s1787_s30 + $0x8] sm:$0xff]  ;;  %v361_v9 = vld [vmem:[%s1787_s30 + $0x10] sm:$0xff]  ;;  %v347_v11 = vld [vmem:[%s1778_s27 + $0x20] sm:$0xff]  ;;  %s1879_s12 = scalar_lea.vmem %s2094_s0, %s1488_s9  ;;  %s1979_s16 = scalar_lea.vmem %s2098_s4, %s1488_s9 }
  0x16   : > { %v348_v10 = vld [vmem:[%s1778_s27 + $0x28] sm:$0xff]  ;;  %v350_v13 = vld [vmem:[%s1778_s27 + $0x38] sm:$0xff]  ;;  %v349_v14 = vld [vmem:[%s1778_s27 + $0x30] sm:$0xff] }
  0x17   : > { %v364_v16 = vld [vmem:[%s1787_s30 + $0x28] sm:$0xff]  ;;  %v363_v17 = vld [vmem:[%s1787_s30 + $0x20] sm:$0xff]  ;;  %v366_v18 = vld [vmem:[%s1787_s30 + $0x38] sm:$0xff] }
  0x18   : > { %426 = vperm.xlu1 %1646, %v346_v4   ;;  %416 = vperm.xlu0 %1645, %v344_v5   ;;  %v365_v19 = vld [vmem:[%s1787_s30 + $0x30] sm:$0xff]  ;;  %v352_v20 = vld [vmem:[%s1778_s27 + $0x48] sm:$0xff]  ;;  %v351_v21 = vld [vmem:[%s1778_s27 + $0x40] sm:$0xff] }
  0x19   : > { %v354_v22 = vld [vmem:[%s1778_s27 + $0x58] sm:$0xff]  ;;  %v353_v23 = vld [vmem:[%s1778_s27 + $0x50] sm:$0xff]  ;;  %v368_v24 = vld [vmem:[%s1787_s30 + $0x48] sm:$0xff] }
  0x1a   : > { %v367_v25 = vld [vmem:[%s1787_s30 + $0x40] sm:$0xff]  ;;  %v370_v26 = vld [vmem:[%s1787_s30 + $0x58] sm:$0xff]  ;;  %v369_v27 = vld [vmem:[%s1787_s30 + $0x50] sm:$0xff] }
  0x1b   : > { %v356_v28 = vld [vmem:[%s1778_s27 + $0x68] sm:$0xff]  ;;  %v355_v29 = vld [vmem:[%s1778_s27 + $0x60] sm:$0xff]  ;;  %v358_v30 = vld [vmem:[%s1778_s27 + $0x78] sm:$0xff] }
  0x1c   : > { %512 = vperm.xlu1 %1646, %v360_v6   ;;  %507 = vperm.xlu0 %1645, %v359_v7   ;;  %v357_v31 = vld [vmem:[%s1778_s27 + $0x70] sm:$0xff]  ;;  %v372_v32 = vld [vmem:[%s1787_s30 + $0x68] sm:$0xff]  ;;  %v371_v33 = vld [vmem:[%s1787_s30 + $0x60] sm:$0xff] }
  0x1d   : > { %v374_v34 = vld [vmem:[%s1787_s30 + $0x78] sm:$0xff]  ;;  %v373_v35 = vld [vmem:[%s1787_s30 + $0x70] sm:$0xff]  ;;  %v1832_v40 = vld [vmem:[#allocation2 + $0x28] sm:$0xff] }
  0x1e   : > { %v1834_v41 = vld [vmem:[#allocation2 + $0x20] sm:$0xff]  ;;  %v1838_v42 = vld [vmem:[#allocation2 + $0x38] sm:$0xff]  ;;  %v1840_v43 = vld [vmem:[#allocation2 + $0x30] sm:$0xff] }
  0x1f   : > { %v1844_v44 = vld [vmem:[#allocation2 + $0x48] sm:$0xff]  ;;  %v1846_v45 = vld [vmem:[#allocation2 + $0x40] sm:$0xff]  ;;  %v1850_v46 = vld [vmem:[#allocation2 + $0x58] sm:$0xff] }
  0x20   : > { %522 = vperm.xlu1 %1646, %v362_v8   ;;  %517 = vperm.xlu0 %1645, %v361_v9   ;;  %v1852_v47 = vld [vmem:[#allocation2 + $0x50] sm:$0xff]  ;;  %v1856_v48 = vld [vmem:[#allocation2 + $0x68] sm:$0xff]  ;;  %v1858_v49 = vld [vmem:[#allocation2 + $0x60] sm:$0xff] }
  0x21   : > { %v1862_v50 = vld [vmem:[#allocation2 + $0x78] sm:$0xff]  ;;  %v1864_v51 = vld [vmem:[#allocation2 + $0x70] sm:$0xff]  ;;  %v393_v55 = vld [vmem:[%s1879_s12] sm:$0xff] }
  0x22   : > { %v394_v58 = vld [vmem:[%s1879_s12 + $0x8] sm:$0xff]  ;;  %v395_v62 = vld [vmem:[%s1879_s12 + $0x10] sm:$0xff]  ;;  %v396_v63 = vld [vmem:[%s1879_s12 + $0x18] sm:$0xff] }
  0x24   : > { %436 = vperm.xlu1 %1646, %v348_v10   ;;  %431 = vperm.xlu0 %1645, %v347_v11  }
  0x28   : > { %446 = vperm.xlu1 %1646, %v350_v13   ;;  %441 = vperm.xlu0 %1645, %v349_v14  }
  0x2c   : > { %532 = vperm.xlu1 %1646, %v364_v16   ;;  %527 = vperm.xlu0 %1645, %v363_v17  }
  0x30   : > { %542 = vperm.xlu1 %1646, %v366_v18   ;;  %537 = vperm.xlu0 %1645, %v365_v19  }
  0x34   : > { %456 = vperm.xlu1 %1646, %v352_v20   ;;  %451 = vperm.xlu0 %1645, %v351_v21  }
  0x38   : > { %466 = vperm.xlu1 %1646, %v354_v22   ;;  %461 = vperm.xlu0 %1645, %v353_v23  }
  0x3c   : > { %552 = vperm.xlu1 %1646, %v368_v24   ;;  %547 = vperm.xlu0 %1645, %v367_v25   ;;  %v398_v25 = vld [vmem:[%s1879_s12 + $0x28] sm:$0xff] }
  0x40   : > { %562 = vperm.xlu1 %1646, %v370_v26   ;;  %557 = vperm.xlu0 %1645, %v369_v27   ;;  %v397_v26 = vld [vmem:[%s1879_s12 + $0x20] sm:$0xff] }
  0x44   : > { %476 = vperm.xlu1 %1646, %v356_v28   ;;  %471 = vperm.xlu0 %1645, %v355_v29  }
  0x48   : > { %486 = vperm.xlu1 %1646, %v358_v30   ;;  %481 = vperm.xlu0 %1645, %v357_v31  }
  0x4c   : > { %572 = vperm.xlu1 %1646, %v372_v32   ;;  %567 = vperm.xlu0 %1645, %v371_v33  }
  0x50   : > { %582 = vperm.xlu1 %1646, %v374_v34   ;;  %577 = vperm.xlu0 %1645, %v373_v35   ;;  %v400_v34 = vld [vmem:[%s1879_s12 + $0x38] sm:$0xff]  ;;  %v399_v35 = vld [vmem:[%s1879_s12 + $0x30] sm:$0xff] }
  0x54   : > { %924 = vperm.xlu1 %1646, %v1820_v36   ;;  %919 = vperm.xlu0 %1645, %v1822_v37  }
  0x58   : > { %934 = vperm.xlu1 %1646, %v1826_v38   ;;  %929 = vperm.xlu0 %1645, %v1828_v39  }
  0x5c   : > { %944 = vperm.xlu1 %1646, %v1832_v40   ;;  %939 = vperm.xlu0 %1645, %v1834_v41  }
  0x60   : > { %954 = vperm.xlu1 %1646, %v1838_v42   ;;  %949 = vperm.xlu0 %1645, %v1840_v43  }
  0x64   : > { %964 = vperm.xlu1 %1646, %v1844_v44   ;;  %959 = vperm.xlu0 %1645, %v1846_v45  }
  0x68   : > { %974 = vperm.xlu1 %1646, %v1850_v46   ;;  %969 = vperm.xlu0 %1645, %v1852_v47  }
  0x6c   : > { %984 = vperm.xlu1 %1646, %v1856_v48   ;;  %979 = vperm.xlu0 %1645, %v1858_v49  }
  0x70   : > { %994 = vperm.xlu1 %1646, %v1862_v50   ;;  %989 = vperm.xlu0 %1645, %v1864_v51  }
  0x93   : > { %v422_v52 = vpop.permute.xlu1 %421  ;;  %v412_v53 = vpop.permute.xlu0 %411 }
  0x94   : > { %v489_v60 = vmul.f32 %v412_v53, %v393_v55  ;;  %v491_v4 = vmul.f32 %v422_v52, %v395_v62 }
  0x97   : > { %v427_v56 = vpop.permute.xlu1 %426  ;;  %v417_v57 = vpop.permute.xlu0 %416 }
  0x98   : > { %v490_v61 = vmul.f32 %v417_v57, %v394_v58  ;;  %v492_v5 = vmul.f32 %v427_v56, %v396_v63 }
  0x9b   : > { %v513_v0 = vpop.permute.xlu1 %512  ;;  %v508_v1 = vpop.permute.xlu0 %507 }
  0x9c   : > { %v586_v2 = vsub.f32 %v490_v61, %v513_v0  ;;  %v585_v3 = vsub.f32 %v489_v60, %v508_v1 }
  0x9e   : > { %v607_v6 = vsel %vm605_vm2, %v586_v2, 0.0  ;;  %v606_v7 = vsel %vm605_vm2, %v585_v3, 0.0 }
  0x9f   : > { %v523_v8 = vpop.permute.xlu1 %522  ;;  %v518_v9 = vpop.permute.xlu0 %517  ;;  %1208 = vrot.lane.b32.xlu1 %v607_v6, %s1689_s13  ;;  %1206 = vrot.lane.b32.xlu0 %v606_v7, %s1689_s13  ;;  %v622_v10 = vpack.c.bf16 %v607_v6, %v606_v7 }
  0xa0   : > { %v588_v11 = vsub.f32 %v492_v5, %v523_v8  ;;  %v587_v12 = vsub.f32 %v491_v4, %v518_v9 }
  0xa1   : > { %1568 = vmatprep.mubr.msk.bf16.mxu0 %vm670_vm3, %v622_v10  ;;  %v630_v13 = vunpack.c.l.bf16 %v622_v10  ;;  %v631_v14 = vunpack.c.h.bf16 %v622_v10 }
  0xa2   : > { %v609_v15 = vsel %vm605_vm2, %v588_v11, 0.0  ;;  %v608_v16 = vsel %vm605_vm2, %v587_v12, 0.0 }
  0xa3   : > { %v437_v17 = vpop.permute.xlu1 %436  ;;  %v432_v18 = vpop.permute.xlu0 %431  ;;  %1212 = vrot.lane.b32.xlu1 %v609_v15, %s1689_s13  ;;  %v623_v19 = vpack.c.bf16 %v609_v15, %v608_v16  ;;  %1210 = vrot.lane.b32.xlu0 %v608_v16, %s1689_s13  ;;  %v646_v20 = vsub.f32 %v606_v7, %v630_v13  ;;  %v647_v21 = vsub.f32 %v607_v6, %v631_v14  ;;  %v402_v14 = vld [vmem:[%s1879_s12 + $0x48] sm:$0xff] }
  0xa4   : > { %v494_v32 = vmul.f32 %v437_v17, %v398_v25  ;;  %v493_v33 = vmul.f32 %v432_v18, %v397_v26 }
  0xa5   : > { %v632_v22 = vunpack.c.l.bf16 %v623_v19  ;;  %v633_v23 = vunpack.c.h.bf16 %v623_v19  ;;  %1569 = vmatmul.mubr.msk.bf16.vlgmr.msra.gmra.mrb[0].mxu0 %vm670_vm3, %v623_v19  ;;  %v662_v24 = vpack.c.bf16 %v647_v21, %v646_v20 }
  0xa7   : > { %v648_v27 = vsub.f32 %v608_v16, %v632_v22  ;;  %v447_v28 = vpop.permute.xlu1 %446  ;;  %v442_v29 = vpop.permute.xlu0 %441  ;;  %1550 = vmatprep.mubr.msk.bf16.mxu1 %vm670_vm3, %v662_v24  ;;  %v649_v30 = vsub.f32 %v609_v15, %v633_v23  ;;  %v401_v15 = vld [vmem:[%s1879_s12 + $0x40] sm:$0xff]  ;;  %v404_v23 = vld [vmem:[%s1879_s12 + $0x58] sm:$0xff]  ;;  %v403_v24 = vld [vmem:[%s1879_s12 + $0x50] sm:$0xff] }
  0xa8   : > { %v496_v56 = vmul.f32 %v447_v28, %v400_v34  ;;  %v495_v57 = vmul.f32 %v442_v29, %v399_v35 }
  0xa9   : > { %v663_v31 = vpack.c.bf16 %v649_v30, %v648_v27 }
  0xab   : > { %v533_v52 = vpop.permute.xlu1 %532  ;;  %v528_v53 = vpop.permute.xlu0 %527  ;;  %1551 = vmatmul.mubr.msk.bf16.vlgmr.msra.gmra.mrb[0].mxu1 %vm670_vm3, %v663_v31 }
  0xac   : > { %v590_v54 = vsub.f32 %v494_v32, %v533_v52  ;;  %v589_v55 = vsub.f32 %v493_v33, %v528_v53 }
  0xae   : > { %v611_v58 = vsel %vm605_vm2, %v590_v54, 0.0  ;;  %v610_v60 = vsel %vm605_vm2, %v589_v55, 0.0 }
  0xaf   : > { %v543_v61 = vpop.permute.xlu1 %542  ;;  %v538_v62 = vpop.permute.xlu0 %537  ;;  %1216 = vrot.lane.b32.xlu1 %v611_v58, %s1689_s13  ;;  %v624_v63 = vpack.c.bf16 %v611_v58, %v610_v60  ;;  %1214 = vrot.lane.b32.xlu0 %v610_v60, %s1689_s13 }
  0xb0   : > { %v592_v0 = vsub.f32 %v496_v56, %v543_v61  ;;  %v591_v1 = vsub.f32 %v495_v57, %v538_v62 }
  0xb1   : > { %v634_v2 = vunpack.c.l.bf16 %v624_v63  ;;  %v635_v3 = vunpack.c.h.bf16 %v624_v63  ;;  %1572 = vmatprep.mubr.msk.bf16.mxu0 %vm670_vm3, %v624_v63 }
  0xb2   : > { %v613_v4 = vsel %vm605_vm2, %v592_v0, 0.0  ;;  %v612_v5 = vsel %vm605_vm2, %v591_v1, 0.0 }
  0xb3   : > { %v650_v6 = vsub.f32 %v610_v60, %v634_v2  ;;  %v457_v7 = vpop.permute.xlu1 %456  ;;  %v452_v8 = vpop.permute.xlu0 %451  ;;  %1220 = vrot.lane.b32.xlu1 %v613_v4, %s1689_s13  ;;  %v625_v9 = vpack.c.bf16 %v613_v4, %v612_v5  ;;  %1218 = vrot.lane.b32.xlu0 %v612_v5, %s1689_s13  ;;  %v651_v10 = vsub.f32 %v611_v58, %v635_v3  ;;  %v406_v3 = vld [vmem:[%s1879_s12 + $0x68] sm:$0xff] }
  0xb4   : > { %v498_v21 = vmul.f32 %v457_v7, %v402_v14  ;;  %v497_v22 = vmul.f32 %v452_v8, %v401_v15 }
  0xb5   : > { %v636_v11 = vunpack.c.l.bf16 %v625_v9  ;;  %v637_v12 = vunpack.c.h.bf16 %v625_v9  ;;  %1573 = vmatmul.mubr.msk.bf16.gmra.mrb[4].mxu0 %vm670_vm3, %v625_v9  ;;  %v664_v13 = vpack.c.bf16 %v651_v10, %v650_v6 }
  0xb7   : > { %v652_v16 = vsub.f32 %v612_v5, %v636_v11  ;;  %v467_v17 = vpop.permute.xlu1 %466  ;;  %v462_v18 = vpop.permute.xlu0 %461  ;;  %1554 = vmatprep.mubr.msk.bf16.mxu1 %vm670_vm3, %v664_v13  ;;  %v653_v19 = vsub.f32 %v613_v4, %v637_v12  ;;  %v405_v4 = vld [vmem:[%s1879_s12 + $0x60] sm:$0xff]  ;;  %v408_v12 = vld [vmem:[%s1879_s12 + $0x78] sm:$0xff]  ;;  %v407_v13 = vld [vmem:[%s1879_s12 + $0x70] sm:$0xff] }
  0xb8   : > { %v500_v29 = vmul.f32 %v467_v17, %v404_v23  ;;  %v499_v30 = vmul.f32 %v462_v18, %v403_v24 }
  0xb9   : > { %v665_v20 = vpack.c.bf16 %v653_v19, %v652_v16 }
  0xbb   : > { %v553_v25 = vpop.permute.xlu1 %552  ;;  %v548_v26 = vpop.permute.xlu0 %547  ;;  %1555 = vmatmul.mubr.msk.bf16.gmra.mrb[4].mxu1 %vm670_vm3, %v665_v20 }
  0xbc   : > { %v594_v27 = vsub.f32 %v498_v21, %v553_v25  ;;  %v593_v28 = vsub.f32 %v497_v22, %v548_v26 }
  0xbe   : > { %v615_v31 = vsel %vm605_vm2, %v594_v27, 0.0  ;;  %v614_v32 = vsel %vm605_vm2, %v593_v28, 0.0 }
  0xbf   : > { %v563_v33 = vpop.permute.xlu1 %562  ;;  %v558_v34 = vpop.permute.xlu0 %557  ;;  %1224 = vrot.lane.b32.xlu1 %v615_v31, %s1689_s13  ;;  %v626_v35 = vpack.c.bf16 %v615_v31, %v614_v32  ;;  %1222 = vrot.lane.b32.xlu0 %v614_v32, %s1689_s13 }
  0xc0   : > { %v596_v52 = vsub.f32 %v500_v29, %v563_v33  ;;  %v595_v53 = vsub.f32 %v499_v30, %v558_v34 }
  0xc1   : > { %v638_v54 = vunpack.c.l.bf16 %v626_v35  ;;  %v639_v55 = vunpack.c.h.bf16 %v626_v35  ;;  %1576 = vmatprep.mubr.msk.bf16.mxu0 %vm670_vm3, %v626_v35 }
  0xc2   : > { %v617_v56 = vsel %vm605_vm2, %v596_v52, 0.0  ;;  %v616_v57 = vsel %vm605_vm2, %v595_v53, 0.0 }
  0xc3   : > { %v654_v58 = vsub.f32 %v614_v32, %v638_v54  ;;  %v477_v60 = vpop.permute.xlu1 %476  ;;  %v472_v61 = vpop.permute.xlu0 %471  ;;  %1228 = vrot.lane.b32.xlu1 %v617_v56, %s1689_s13  ;;  %v627_v62 = vpack.c.bf16 %v617_v56, %v616_v57  ;;  %1226 = vrot.lane.b32.xlu0 %v616_v57, %s1689_s13  ;;  %v655_v63 = vsub.f32 %v615_v31, %v639_v55 }
  0xc4   : > { %v502_v10 = vmul.f32 %v477_v60, %v406_v3  ;;  %v501_v11 = vmul.f32 %v472_v61, %v405_v4 }
  0xc5   : > { %v640_v0 = vunpack.c.l.bf16 %v627_v62  ;;  %v641_v1 = vunpack.c.h.bf16 %v627_v62  ;;  %1577 = vmatmul.mubr.msk.bf16.gmra.mrb[8].mxu0 %vm670_vm3, %v627_v62  ;;  %v666_v2 = vpack.c.bf16 %v655_v63, %v654_v58 }
  0xc7   : > { %v656_v5 = vsub.f32 %v616_v57, %v640_v0  ;;  %v487_v6 = vpop.permute.xlu1 %486  ;;  %v482_v7 = vpop.permute.xlu0 %481  ;;  %1558 = vmatprep.mubr.msk.bf16.mxu1 %vm670_vm3, %v666_v2  ;;  %v657_v8 = vsub.f32 %v617_v56, %v641_v1 }
  0xc8   : > { %v504_v18 = vmul.f32 %v487_v6, %v408_v12  ;;  %v503_v19 = vmul.f32 %v482_v7, %v407_v13 }
  0xc9   : > { %v667_v9 = vpack.c.bf16 %v657_v8, %v656_v5 }
  0xcb   : > { %v573_v14 = vpop.permute.xlu1 %572  ;;  %v568_v15 = vpop.permute.xlu0 %567  ;;  %1559 = vmatmul.mubr.msk.bf16.gmra.mrb[8].mxu1 %vm670_vm3, %v667_v9 }
  0xcc   : > { %v598_v16 = vsub.f32 %v502_v10, %v573_v14  ;;  %v597_v17 = vsub.f32 %v501_v11, %v568_v15 }
  0xce   : > { %v619_v20 = vsel %vm605_vm2, %v598_v16, 0.0  ;;  %v618_v21 = vsel %vm605_vm2, %v597_v17, 0.0 }
  0xcf   : > { %v583_v22 = vpop.permute.xlu1 %582  ;;  %v578_v23 = vpop.permute.xlu0 %577  ;;  %1232 = vrot.lane.b32.xlu1 %v619_v20, %s1689_s13  ;;  %v628_v24 = vpack.c.bf16 %v619_v20, %v618_v21  ;;  %1230 = vrot.lane.b32.xlu0 %v618_v21, %s1689_s13 }
  0xd0   : > { %v600_v25 = vsub.f32 %v504_v18, %v583_v22  ;;  %v599_v26 = vsub.f32 %v503_v19, %v578_v23 }
  0xd1   : > { %v642_v27 = vunpack.c.l.bf16 %v628_v24  ;;  %v643_v28 = vunpack.c.h.bf16 %v628_v24  ;;  %1580 = vmatprep.mubr.msk.bf16.mxu0 %vm670_vm3, %v628_v24 }
  0xd2   : > { %v1957_v29 = vsel %vm605_vm2, %v600_v25, 0.0  ;;  %v1961_v30 = vsel %vm605_vm2, %v599_v26, 0.0 }
  0xd3   : > { %v629_v31 = vpack.c.bf16 %v1957_v29, %v1961_v30  ;;  %v658_v32 = vsub.f32 %v618_v21, %v642_v27  ;;  %v659_v33 = vsub.f32 %v619_v20, %v643_v28  ;;  %v920_v57 = vpop.permute.xlu0 %919  ;;  %v925_v61 = vpop.permute.xlu1 %924 }
  0xd5   : > { %v644_v34 = vunpack.c.l.bf16 %v629_v31  ;;  %v645_v35 = vunpack.c.h.bf16 %v629_v31  ;;  %1581 = vmatmul.mubr.msk.bf16.gmra.mrb[12].mxu0 %vm670_vm3, %v629_v31  ;;  %v668_v52 = vpack.c.bf16 %v659_v33, %v658_v32 }
  0xd7   : > { %v660_v53 = vsub.f32 %v1961_v30, %v644_v34  ;;  %v661_v54 = vsub.f32 %v1957_v29, %v645_v35  ;;  %1562 = vmatprep.mubr.msk.bf16.mxu1 %vm670_vm3, %v668_v52  ;;  %v930_v1 = vpop.permute.xlu0 %929  ;;  %v935_v7 = vpop.permute.xlu1 %934 }
  0xd9   : > { %v669_v55 = vpack.c.bf16 %v661_v54, %v660_v53 }
  0xdb   : > { %1563 = vmatmul.mubr.msk.bf16.gmra.mrb[12].mxu1 %vm670_vm3, %v669_v55  ;;  %v940_v26 = vpop.permute.xlu0 %939  ;;  %v945_v35 = vpop.permute.xlu1 %944 }
 0x178   : > { %v1570_v59 = vpop.f32.mrb[0].mxu0 }
 0x179   : > { %v854_v56 = vpop.f32.mrb[1].mxu0 }
 0x17a   : > { %v1571_v58 = vpop.f32.mrb[2].mxu0 }
 0x17b   : > { %v857_v60 = vpop.f32.mrb[3].mxu0 }
 0x17e   : > { %v1552_v62 = vpop.f32.mrb[0].mxu1 }
 0x17f   : > { %v863_v63 = vadd.f32 %v1570_v59, %v1552_v62  ;;  %v733_v0 = vpop.f32.mrb[1].mxu1 }
 0x180   : > { %v855_v2 = vadd.f32 %v854_v56, %v733_v0  ;;  %v1553_v3 = vpop.f32.mrb[2].mxu1 }
 0x181   : > { %v999_v4 = vadd.f32 %v930_v1, %v863_v63  ;;  %v866_v5 = vadd.f32 %v1571_v58, %v1553_v3  ;;  %1130 = vrot.lane.b32.xlu0 %v863_v63, %s1689_s13  ;;  %v736_v6 = vpop.f32.mrb[3].mxu1  ;;  %v950_v58 = vpop.permute.xlu0 %949 }
 0x182   : > { %v997_v8 = vadd.f32 %v920_v57, %v855_v2  ;;  %v858_v9 = vadd.f32 %v857_v60, %v736_v6  ;;  %v955_v1 = vpop.permute.xlu1 %954 }
 0x183   : > { %v1015_v10 = vmul.f32 0.15915494, %v999_v4  ;;  %v1000_v11 = vadd.f32 %v935_v7, %v866_v5  ;;  %1132 = vrot.lane.b32.xlu1 %v866_v5, %s1689_s13 }
 0x184   : > { %v1013_v12 = vmul.f32 0.15915494, %v997_v8  ;;  %v998_v13 = vadd.f32 %v925_v61, %v858_v9 }
 0x185   : > { %v1031_v14 = vfloor.f32 %v1015_v10  ;;  %v1016_v15 = vmul.f32 0.15915494, %v1000_v11  ;;  %1126 = vrot.lane.b32.xlu0 %v855_v2, %s1689_s13 }
 0x186   : > { %v1029_v16 = vfloor.f32 %v1013_v12  ;;  %v1014_v17 = vmul.f32 0.15915494, %v998_v13 }
 0x187   : > { %v1047_v18 = vmul.f32 6.2831855, %v1031_v14  ;;  %v1032_v19 = vfloor.f32 %v1016_v15  ;;  %1128 = vrot.lane.b32.xlu1 %v858_v9, %s1689_s13 }
 0x188   : > { %v1045_v20 = vmul.f32 6.2831855, %v1029_v16  ;;  %v1030_v21 = vfloor.f32 %v1014_v17  ;;  %v1574_v22 = vpop.f32.mrb[4].mxu0 }
 0x189   : > { %v1063_v23 = vsub.f32 %v999_v4, %v1047_v18  ;;  %v1048_v24 = vmul.f32 6.2831855, %v1032_v19  ;;  %v870_v25 = vpop.f32.mrb[5].mxu0 }
 0x18a   : > { %v1061_v27 = vsub.f32 %v997_v8, %v1045_v20  ;;  %v1046_v28 = vmul.f32 6.2831855, %v1030_v21  ;;  %v1575_v31 = vpop.f32.mrb[6].mxu0  ;;  %v960_v20 = vpop.permute.xlu0 %959 }
 0x18b   : > { %v1514_v32 = vadd.f32 -3.1415927, %v1063_v23  ;;  %v1064_v33 = vsub.f32 %v1000_v11, %v1048_v24  ;;  %v873_v34 = vpop.f32.mrb[7].mxu0 }
 0x18c   : > { %v1512_v52 = vadd.f32 -3.1415927, %v1061_v27  ;;  %v1062_v53 = vsub.f32 %v998_v13, %v1046_v28  ;;  %v965_v27 = vpop.permute.xlu1 %964 }
 0x18d   : > { %1096 = vst.msk [vmem:[%s1979_s16 + $0x10] sm:$0xff] %vm1093_vm4, %v1514_v32  ;;  %v1515_v54 = vadd.f32 -3.1415927, %v1064_v33 }
 0x18e   : > { %1094 = vst.msk [vmem:[%s1979_s16] sm:$0xff] %vm1093_vm4, %v1512_v52  ;;  %v1513_v55 = vadd.f32 -3.1415927, %v1062_v53  ;;  %v1556_v59 = vpop.f32.mrb[4].mxu1  ;;  %v970_v53 = vpop.permute.xlu0 %969 }
 0x18f   : > { %1097 = vst.msk [vmem:[%s1979_s16 + $0x18] sm:$0xff] %vm1093_vm4, %v1515_v54  ;;  %v879_v56 = vadd.f32 %v1574_v22, %v1556_v59  ;;  %v749_v57 = vpop.f32.mrb[5].mxu1 }
 0x190   : > { %1095 = vst.msk [vmem:[%s1979_s16 + $0x8] sm:$0xff] %vm1093_vm4, %v1513_v55  ;;  %v871_v60 = vadd.f32 %v870_v25, %v749_v57  ;;  %v1557_v61 = vpop.f32.mrb[6].mxu1 }
 0x191   : > { %v1003_v62 = vadd.f32 %v950_v58, %v879_v56  ;;  %v882_v63 = vadd.f32 %v1575_v31, %v1557_v61  ;;  %1138 = vrot.lane.b32.xlu0 %v879_v56, %s1689_s13  ;;  %v752_v0 = vpop.f32.mrb[7].mxu1  ;;  %v975_v58 = vpop.permute.xlu1 %974 }
 0x192   : > { %v1001_v2 = vadd.f32 %v940_v26, %v871_v60  ;;  %v874_v3 = vadd.f32 %v873_v34, %v752_v0 }
 0x193   : > { %v1019_v4 = vmul.f32 0.15915494, %v1003_v62  ;;  %v1004_v5 = vadd.f32 %v955_v1, %v882_v63  ;;  %1140 = vrot.lane.b32.xlu1 %v882_v63, %s1689_s13 }
 0x194   : > { %v1017_v6 = vmul.f32 0.15915494, %v1001_v2  ;;  %v1002_v7 = vadd.f32 %v945_v35, %v874_v3 }
 0x195   : > { %v1035_v8 = vfloor.f32 %v1019_v4  ;;  %v1020_v9 = vmul.f32 0.15915494, %v1004_v5  ;;  %1134 = vrot.lane.b32.xlu0 %v871_v60, %s1689_s13 }
 0x196   : > { %v1033_v10 = vfloor.f32 %v1017_v6  ;;  %v1018_v11 = vmul.f32 0.15915494, %v1002_v7 }
 0x197   : > { %v1051_v12 = vmul.f32 6.2831855, %v1035_v8  ;;  %v1036_v13 = vfloor.f32 %v1020_v9  ;;  %1136 = vrot.lane.b32.xlu1 %v874_v3, %s1689_s13 }
 0x198   : > { %v1049_v14 = vmul.f32 6.2831855, %v1033_v10  ;;  %v1034_v15 = vfloor.f32 %v1018_v11  ;;  %v1578_v16 = vpop.f32.mrb[8].mxu0 }
 0x199   : > { %v1067_v17 = vsub.f32 %v1003_v62, %v1051_v12  ;;  %v1052_v18 = vmul.f32 6.2831855, %v1036_v13  ;;  %v886_v19 = vpop.f32.mrb[9].mxu0 }
 0x19a   : > { %v1065_v21 = vsub.f32 %v1001_v2, %v1049_v14  ;;  %v1050_v22 = vmul.f32 6.2831855, %v1034_v15  ;;  %v1579_v23 = vpop.f32.mrb[10].mxu0  ;;  %v980_v14 = vpop.permute.xlu0 %979 }
 0x19b   : > { %v1518_v24 = vadd.f32 -3.1415927, %v1067_v17  ;;  %v1068_v25 = vsub.f32 %v1004_v5, %v1052_v18  ;;  %v889_v26 = vpop.f32.mrb[11].mxu0 }
 0x19c   : > { %v1516_v28 = vadd.f32 -3.1415927, %v1065_v21  ;;  %v1066_v31 = vsub.f32 %v1002_v7, %v1050_v22  ;;  %v985_v21 = vpop.permute.xlu1 %984 }
 0x19d   : > { %1100 = vst.msk [vmem:[%s1979_s16 + $0x30] sm:$0xff] %vm1093_vm4, %v1518_v24  ;;  %v1519_v32 = vadd.f32 -3.1415927, %v1068_v25 }
 0x19e   : > { %1098 = vst.msk [vmem:[%s1979_s16 + $0x20] sm:$0xff] %vm1093_vm4, %v1516_v28  ;;  %v1517_v33 = vadd.f32 -3.1415927, %v1066_v31  ;;  %v1560_v34 = vpop.f32.mrb[8].mxu1  ;;  %v990_v31 = vpop.permute.xlu0 %989 }
 0x19f   : > { %1101 = vst.msk [vmem:[%s1979_s16 + $0x38] sm:$0xff] %vm1093_vm4, %v1519_v32  ;;  %v895_v35 = vadd.f32 %v1578_v16, %v1560_v34  ;;  %v765_v52 = vpop.f32.mrb[9].mxu1 }
 0x1a0   : > { %1099 = vst.msk [vmem:[%s1979_s16 + $0x28] sm:$0xff] %vm1093_vm4, %v1517_v33  ;;  %v887_v54 = vadd.f32 %v886_v19, %v765_v52  ;;  %v1561_v55 = vpop.f32.mrb[10].mxu1 }
 0x1a1   : > { %v1007_v59 = vadd.f32 %v970_v53, %v895_v35  ;;  %v898_v56 = vadd.f32 %v1579_v23, %v1561_v55  ;;  %1146 = vrot.lane.b32.xlu0 %v895_v35, %s1689_s13  ;;  %v768_v57 = vpop.f32.mrb[11].mxu1  ;;  %v995_v53 = vpop.permute.xlu1 %994 }
 0x1a2   : > { %v1005_v60 = vadd.f32 %v960_v20, %v887_v54  ;;  %v890_v61 = vadd.f32 %v889_v26, %v768_v57 }
 0x1a3   : > { %v1023_v62 = vmul.f32 0.15915494, %v1007_v59  ;;  %v1008_v63 = vadd.f32 %v975_v58, %v898_v56  ;;  %1148 = vrot.lane.b32.xlu1 %v898_v56, %s1689_s13 }
 0x1a4   : > { %v1021_v0 = vmul.f32 0.15915494, %v1005_v60  ;;  %v1006_v1 = vadd.f32 %v965_v27, %v890_v61 }
 0x1a5   : > { %v1039_v2 = vfloor.f32 %v1023_v62  ;;  %v1024_v3 = vmul.f32 0.15915494, %v1008_v63  ;;  %1142 = vrot.lane.b32.xlu0 %v887_v54, %s1689_s13 }
 0x1a6   : > { %v1037_v4 = vfloor.f32 %v1021_v0  ;;  %v1022_v5 = vmul.f32 0.15915494, %v1006_v1 }
 0x1a7   : > { %v1055_v6 = vmul.f32 6.2831855, %v1039_v2  ;;  %v1040_v7 = vfloor.f32 %v1024_v3  ;;  %1144 = vrot.lane.b32.xlu1 %v890_v61, %s1689_s13 }
 0x1a8   : > { %v1053_v8 = vmul.f32 6.2831855, %v1037_v4  ;;  %v1038_v9 = vfloor.f32 %v1022_v5  ;;  %v1582_v10 = vpop.f32.mrb[12].mxu0 }
 0x1a9   : > { %v1071_v11 = vsub.f32 %v1007_v59, %v1055_v6  ;;  %v1056_v12 = vmul.f32 6.2831855, %v1040_v7  ;;  %v902_v13 = vpop.f32.mrb[13].mxu0 }
 0x1aa   : > { %v1069_v15 = vsub.f32 %v1005_v60, %v1053_v8  ;;  %v1054_v16 = vmul.f32 6.2831855, %v1038_v9  ;;  %v1583_v17 = vpop.f32.mrb[14].mxu0 }
 0x1ab   : > { %v1522_v18 = vadd.f32 -3.1415927, %v1071_v11  ;;  %v1072_v19 = vsub.f32 %v1008_v63, %v1056_v12  ;;  %v905_v20 = vpop.f32.mrb[15].mxu0 }
 0x1ac   : > { %v1520_v22 = vadd.f32 -3.1415927, %v1069_v15  ;;  %v1070_v23 = vsub.f32 %v1006_v1, %v1054_v16 }
 0x1ad   : > { %1104 = vst.msk [vmem:[%s1979_s16 + $0x50] sm:$0xff] %vm1093_vm4, %v1522_v18  ;;  %v1523_v24 = vadd.f32 -3.1415927, %v1072_v19 }
 0x1ae   : > { %1102 = vst.msk [vmem:[%s1979_s16 + $0x40] sm:$0xff] %vm1093_vm4, %v1520_v22  ;;  %v1521_v25 = vadd.f32 -3.1415927, %v1070_v23  ;;  %v1564_v26 = vpop.f32.mrb[12].mxu1 }
 0x1af   : > { %1105 = vst.msk [vmem:[%s1979_s16 + $0x58] sm:$0xff] %vm1093_vm4, %v1523_v24  ;;  %v911_v27 = vadd.f32 %v1582_v10, %v1564_v26  ;;  %v781_v28 = vpop.f32.mrb[13].mxu1 }
 0x1b0   : > { %1103 = vst.msk [vmem:[%s1979_s16 + $0x48] sm:$0xff] %vm1093_vm4, %v1521_v25  ;;  %v903_v32 = vadd.f32 %v902_v13, %v781_v28  ;;  %v1565_v33 = vpop.f32.mrb[14].mxu1 }
 0x1b1   : > { %v1011_v34 = vadd.f32 %v990_v31, %v911_v27  ;;  %v914_v35 = vadd.f32 %v1583_v17, %v1565_v33  ;;  %1154 = vrot.lane.b32.xlu0 %v911_v27, %s1689_s13  ;;  %v784_v52 = vpop.f32.mrb[15].mxu1 }
 0x1b2   : > { %v1009_v54 = vadd.f32 %v980_v14, %v903_v32  ;;  %v906_v55 = vadd.f32 %v905_v20, %v784_v52  ;;  %v1209_v14 = vpop.permute.xlu1 %1208 }
 0x1b3   : > { %v1027_v59 = vmul.f32 0.15915494, %v1011_v34  ;;  %v1012_v56 = vadd.f32 %v995_v53, %v914_v35  ;;  %1156 = vrot.lane.b32.xlu1 %v914_v35, %s1689_s13 }
 0x1b4   : > { %v1025_v57 = vmul.f32 0.15915494, %v1009_v54  ;;  %v1010_v58 = vadd.f32 %v985_v21, %v906_v55 }
 0x1b5   : > { %v1043_v60 = vfloor.f32 %v1027_v59  ;;  %v1028_v61 = vmul.f32 0.15915494, %v1012_v56  ;;  %1150 = vrot.lane.b32.xlu0 %v903_v32, %s1689_s13 }
 0x1b6   : > { %v1041_v62 = vfloor.f32 %v1025_v57  ;;  %v1026_v63 = vmul.f32 0.15915494, %v1010_v58  ;;  %v1213_v16 = vpop.permute.xlu1 %1212 }
 0x1b7   : > { %v1059_v0 = vmul.f32 6.2831855, %v1043_v60  ;;  %v1044_v1 = vfloor.f32 %v1028_v61  ;;  %1152 = vrot.lane.b32.xlu1 %v906_v55, %s1689_s13 }
 0x1b8   : > { %v1057_v2 = vmul.f32 6.2831855, %v1041_v62  ;;  %v1042_v3 = vfloor.f32 %v1026_v63 }
 0x1b9   : > { %v1075_v4 = vsub.f32 %v1011_v34, %v1059_v0  ;;  %v1060_v5 = vmul.f32 6.2831855, %v1044_v1  ;;  %1234 = vrot.lane.b32.xlu0 %v1961_v30, %s1689_s13  ;;  %v1207_v30 = vpop.permute.xlu0 %1206 }
 0x1ba   : > { %v1073_v6 = vsub.f32 %v1009_v54, %v1057_v2  ;;  %v1058_v7 = vmul.f32 6.2831855, %v1042_v3  ;;  %v1217_v18 = vpop.permute.xlu1 %1216 }
 0x1bb   : > { %v1526_v8 = vadd.f32 -3.1415927, %v1075_v4  ;;  %v1076_v9 = vsub.f32 %v1012_v56, %v1060_v5  ;;  %1236 = vrot.lane.b32.xlu1 %v1957_v29, %s1689_s13 }
 0x1bc   : > { %v1524_v10 = vadd.f32 -3.1415927, %v1073_v6  ;;  %v1074_v11 = vsub.f32 %v1010_v58, %v1058_v7 }
 0x1bd   : > { %1108 = vst.msk [vmem:[%s1979_s16 + $0x70] sm:$0xff] %vm1093_vm4, %v1526_v8  ;;  %v1527_v12 = vadd.f32 -3.1415927, %v1076_v9  ;;  %v1211_v15 = vpop.permute.xlu0 %1210 }
 0x1be   : > { %1106 = vst.msk [vmem:[%s1979_s16 + $0x60] sm:$0xff] %vm1093_vm4, %v1524_v10  ;;  %v1525_v13 = vadd.f32 -3.1415927, %v1074_v11  ;;  %v1221_v29 = vpop.permute.xlu1 %1220 }
 0x1bf   : > { %1109 = vst.msk [vmem:[%s1979_s16 + $0x78] sm:$0xff] %vm1093_vm4, %v1527_v12 }
 0x1c0   : > { %1107 = vst.msk [vmem:[%s1979_s16 + $0x68] sm:$0xff] %vm1093_vm4, %v1525_v13 }
 0x1c1   : > { %v1215_v17 = vpop.permute.xlu0 %1214 }
 0x1c2   : > { %v2031_v21 = vpop.permute.xlu1 %1224 }
 0x1c5   : > { %v1219_v19 = vpop.permute.xlu0 %1218 }
 0x1c6   : > { %v2035_v23 = vpop.permute.xlu1 %1228 }
 0x1c9   : > { %v2029_v20 = vpop.permute.xlu0 %1222 }
 0x1ca   : > { %v2039_v25 = vpop.permute.xlu1 %1232 }
 0x1cd   : > { %v2033_v22 = vpop.permute.xlu0 %1226 }
 0x1d1   : > { %v2037_v24 = vpop.permute.xlu0 %1230 }
 0x1f3   : > { %v1131_v26 = vpop.permute.xlu0 %1130 }
 0x1f4   : > { %v1176_v27 = vadd.f32 %v1131_v26, %v1828_v39 }
 0x1f5   : > { %v1133_v28 = vpop.permute.xlu1 %1132 }
 0x1f6   : > { %v1256_v31 = vadd.f32 %v1211_v15, %v1176_v27  ;;  %v1177_v32 = vadd.f32 %v1133_v28, %v1826_v38 }
 0x1f7   : > { %v1127_v33 = vpop.permute.xlu0 %1126 }
 0x1f8   : > { %v1272_v34 = vmul.f32 0.15915494, %v1256_v31  ;;  %v1257_v35 = vadd.f32 %v1213_v16, %v1177_v32  ;;  %v1174_v52 = vadd.f32 %v1127_v33, %v1822_v37 }
 0x1f9   : > { %v1129_v53 = vpop.permute.xlu1 %1128 }
 0x1fa   : > { %v1288_v54 = vfloor.f32 %v1272_v34  ;;  %v1273_v55 = vmul.f32 0.15915494, %v1257_v35  ;;  %v1254_v59 = vadd.f32 %v1207_v30, %v1174_v52  ;;  %v1175_v56 = vadd.f32 %v1129_v53, %v1820_v36 }
 0x1fc   : > { %v1304_v57 = vmul.f32 6.2831855, %v1288_v54  ;;  %v1289_v58 = vfloor.f32 %v1273_v55  ;;  %v1270_v60 = vmul.f32 0.15915494, %v1254_v59  ;;  %v1255_v61 = vadd.f32 %v1209_v14, %v1175_v56 }
 0x1fe   : > { %v1320_v39 = vsub.f32 %v1256_v31, %v1304_v57  ;;  %v1305_v62 = vmul.f32 6.2831855, %v1289_v58  ;;  %v1286_v63 = vfloor.f32 %v1270_v60  ;;  %v1271_v0 = vmul.f32 0.15915494, %v1255_v61 }
 0x200   : > { %1337 = vst.msk [vmem:[#allocation2 + $0x10] sm:$0xff] %vm326_vm0, %v1320_v39  ;;  %v1321_v38 = vsub.f32 %v1257_v35, %v1305_v62  ;;  %v1302_v1 = vmul.f32 6.2831855, %v1286_v63  ;;  %v1287_v2 = vfloor.f32 %v1271_v0 }
 0x202   : > { %1338 = vst.msk [vmem:[#allocation2 + $0x18] sm:$0xff] %vm326_vm0, %v1321_v38  ;;  %v1318_v37 = vsub.f32 %v1254_v59, %v1302_v1  ;;  %v1303_v3 = vmul.f32 6.2831855, %v1287_v2 }
 0x203   : > { %v1139_v4 = vpop.permute.xlu0 %1138 }
 0x204   : > { %1335 = vst.msk [vmem:[#allocation2] sm:$0xff] %vm326_vm0, %v1318_v37  ;;  %v1319_v36 = vsub.f32 %v1255_v61, %v1303_v3  ;;  %v1180_v5 = vadd.f32 %v1139_v4, %v1840_v43 }
 0x205   : > { %v1141_v6 = vpop.permute.xlu1 %1140 }
 0x206   : > { %1336 = vst.msk [vmem:[#allocation2 + $0x8] sm:$0xff] %vm326_vm0, %v1319_v36  ;;  %v1260_v7 = vadd.f32 %v1219_v19, %v1180_v5  ;;  %v1181_v8 = vadd.f32 %v1141_v6, %v1838_v42 }
 0x207   : > { %v1135_v9 = vpop.permute.xlu0 %1134 }
 0x208   : > { %v1276_v10 = vmul.f32 0.15915494, %v1260_v7  ;;  %v1261_v11 = vadd.f32 %v1221_v29, %v1181_v8  ;;  %v1178_v12 = vadd.f32 %v1135_v9, %v1834_v41 }
 0x209   : > { %v1137_v13 = vpop.permute.xlu1 %1136 }
 0x20a   : > { %v1292_v30 = vfloor.f32 %v1276_v10  ;;  %v1277_v14 = vmul.f32 0.15915494, %v1261_v11  ;;  %v1258_v15 = vadd.f32 %v1215_v17, %v1178_v12  ;;  %v1179_v16 = vadd.f32 %v1137_v13, %v1832_v40 }
 0x20c   : > { %v1308_v26 = vmul.f32 6.2831855, %v1292_v30  ;;  %v1293_v27 = vfloor.f32 %v1277_v14  ;;  %v1274_v43 = vmul.f32 0.15915494, %v1258_v15  ;;  %v1259_v28 = vadd.f32 %v1217_v18, %v1179_v16 }
 0x20e   : > { %v1324_v31 = vsub.f32 %v1260_v7, %v1308_v26  ;;  %v1309_v32 = vmul.f32 6.2831855, %v1293_v27  ;;  %v1290_v19 = vfloor.f32 %v1274_v43  ;;  %v1275_v33 = vmul.f32 0.15915494, %v1259_v28 }
 0x210   : > { %1341 = vst.msk [vmem:[#allocation2 + $0x30] sm:$0xff] %vm326_vm0, %v1324_v31  ;;  %v1325_v42 = vsub.f32 %v1261_v11, %v1309_v32  ;;  %v1306_v29 = vmul.f32 6.2831855, %v1290_v19  ;;  %v1291_v34 = vfloor.f32 %v1275_v33 }
 0x212   : > { %1342 = vst.msk [vmem:[#allocation2 + $0x38] sm:$0xff] %vm326_vm0, %v1325_v42  ;;  %v1322_v41 = vsub.f32 %v1258_v15, %v1306_v29  ;;  %v1307_v35 = vmul.f32 6.2831855, %v1291_v34 }
 0x213   : > { %v1147_v17 = vpop.permute.xlu0 %1146 }
 0x214   : > { %1339 = vst.msk [vmem:[#allocation2 + $0x20] sm:$0xff] %vm326_vm0, %v1322_v41  ;;  %v1323_v40 = vsub.f32 %v1259_v28, %v1307_v35  ;;  %v1184_v52 = vadd.f32 %v1147_v17, %v1852_v47 }
 0x215   : > { %v1149_v18 = vpop.permute.xlu1 %1148 }
 0x216   : > { %1340 = vst.msk [vmem:[#allocation2 + $0x28] sm:$0xff] %vm326_vm0, %v1323_v40  ;;  %v1264_v53 = vadd.f32 %v2033_v22, %v1184_v52  ;;  %v1185_v54 = vadd.f32 %v1149_v18, %v1850_v46 }
 0x217   : > { %v1143_v55 = vpop.permute.xlu0 %1142 }
 0x218   : > { %v1280_v59 = vmul.f32 0.15915494, %v1264_v53  ;;  %v1265_v56 = vadd.f32 %v2035_v23, %v1185_v54  ;;  %v1182_v57 = vadd.f32 %v1143_v55, %v1846_v45 }
 0x219   : > { %v1145_v58 = vpop.permute.xlu1 %1144 }
 0x21a   : > { %v1296_v60 = vfloor.f32 %v1280_v59  ;;  %v1281_v61 = vmul.f32 0.15915494, %v1265_v56  ;;  %v1262_v39 = vadd.f32 %v2029_v20, %v1182_v57  ;;  %v1183_v47 = vadd.f32 %v1145_v58, %v1844_v44 }
 0x21c   : > { %v1312_v62 = vmul.f32 6.2831855, %v1296_v60  ;;  %v1297_v63 = vfloor.f32 %v1281_v61  ;;  %v1278_v0 = vmul.f32 0.15915494, %v1262_v39  ;;  %v1263_v22 = vadd.f32 %v2031_v21, %v1183_v47 }
 0x21e   : > { %v1328_v38 = vsub.f32 %v1264_v53, %v1312_v62  ;;  %v1313_v46 = vmul.f32 6.2831855, %v1297_v63  ;;  %v1294_v1 = vfloor.f32 %v1278_v0  ;;  %v1279_v2 = vmul.f32 0.15915494, %v1263_v22 }
 0x220   : > { %1345 = vst.msk [vmem:[#allocation2 + $0x50] sm:$0xff] %vm326_vm0, %v1328_v38  ;;  %v1329_v23 = vsub.f32 %v1265_v56, %v1313_v46  ;;  %v1310_v45 = vmul.f32 6.2831855, %v1294_v1  ;;  %v1295_v37 = vfloor.f32 %v1279_v2 }
 0x222   : > { %1346 = vst.msk [vmem:[#allocation2 + $0x58] sm:$0xff] %vm326_vm0, %v1329_v23  ;;  %v1326_v3 = vsub.f32 %v1262_v39, %v1310_v45  ;;  %v1311_v20 = vmul.f32 6.2831855, %v1295_v37 }
 0x223   : > { %v1155_v4 = vpop.permute.xlu0 %1154 }
 0x224   : > { %1343 = vst.msk [vmem:[#allocation2 + $0x40] sm:$0xff] %vm326_vm0, %v1326_v3  ;;  %v1327_v44 = vsub.f32 %v1263_v22, %v1311_v20  ;;  %v1188_v7 = vadd.f32 %v1155_v4, %v1864_v51 }
 0x225   : > { %v1157_v36 = vpop.permute.xlu1 %1156 }
 0x226   : > { %1344 = vst.msk [vmem:[#allocation2 + $0x48] sm:$0xff] %vm326_vm0, %v1327_v44  ;;  %v1189_v11 = vadd.f32 %v1157_v36, %v1862_v50 }
 0x227   : > { %v1151_v21 = vpop.permute.xlu0 %1150 }
 0x228   : > { %v1186_v5 = vadd.f32 %v1151_v21, %v1858_v49 }
 0x229   : > { %v1153_v6 = vpop.permute.xlu1 %1152 }
 0x22a   : > { %v1266_v8 = vadd.f32 %v2037_v24, %v1186_v5  ;;  %v1187_v9 = vadd.f32 %v1153_v6, %v1856_v48 }
 0x22b   : > { %v1235_v10 = vpop.permute.xlu0 %1234 }
 0x22c   : > { %v1282_v12 = vmul.f32 0.15915494, %v1266_v8  ;;  %v1267_v13 = vadd.f32 %v2039_v25, %v1187_v9  ;;  %v1268_v30 = vadd.f32 %v1235_v10, %v1188_v7 }
 0x22d   : > { %v1237_v14 = vpop.permute.xlu1 %1236 }
 0x22e   : > { %v1298_v15 = vfloor.f32 %v1282_v12  ;;  %v1283_v16 = vmul.f32 0.15915494, %v1267_v13  ;;  %v1284_v26 = vmul.f32 0.15915494, %v1268_v30  ;;  %v1269_v27 = vadd.f32 %v1237_v14, %v1189_v11 }
 0x230   : > { %v1314_v49 = vmul.f32 6.2831855, %v1298_v15  ;;  %v1299_v43 = vfloor.f32 %v1283_v16  ;;  %v1300_v28 = vfloor.f32 %v1284_v26  ;;  %v1285_v51 = vmul.f32 0.15915494, %v1269_v27 }
 0x232   : > { %v1330_v31 = vsub.f32 %v1266_v8, %v1314_v49  ;;  %v1315_v24 = vmul.f32 6.2831855, %v1299_v43  ;;  %v1316_v32 = vmul.f32 6.2831855, %v1300_v28  ;;  %v1301_v48 = vfloor.f32 %v1285_v51 }
 0x234   : > { %1347 = vst.msk [vmem:[#allocation2 + $0x60] sm:$0xff] %vm326_vm0, %v1330_v31  ;;  %v1331_v50 = vsub.f32 %v1267_v13, %v1315_v24  ;;  %v1332_v19 = vsub.f32 %v1268_v30, %v1316_v32  ;;  %v1317_v33 = vmul.f32 6.2831855, %v1301_v48 }
 0x236   : > { %1348 = vst.msk [vmem:[#allocation2 + $0x68] sm:$0xff] %vm326_vm0, %v1331_v50  ;;  %1349 = vst.msk [vmem:[#allocation2 + $0x70] sm:$0xff] %vm326_vm0, %v1332_v19  ;;  %v1333_v25 = vsub.f32 %v1269_v27, %v1317_v33 }
 0x238   : > { %1350 = vst.msk [vmem:[#allocation2 + $0x78] sm:$0xff] %vm326_vm0, %v1333_v25 }
 0x239 PF: > { %s14_s19 = sadd.s32 1, %s1685_s19   ;;  %s2100_s15 = smov %s1677_s17 }
 0x23a   : > { %p11_p7 = scmp.ge.s32.totalorder %s14_s19, 6   ;;  %s2101_s16 = smov %s1681_s18 }
 0x23b   : > { %s2102_s17 = smov %s2105_s20  ;;  %s2103_s18 = smov %s2109_s21 }
 0x23c   :  { %13 = sbr.rel (!%p11_p7) target bundleno = 3 (0x3), region = 76 }

</bundles_post_ra>
